<compile_context>
chip_gen: v5e
topology: v5e:2x2
jax: 0.10.0
libtpu: 0.0.40
codegen_flags: <defaults>
</compile_context>

<pallas_src>
import jax
import jax.numpy as jnp
from jax.experimental import pallas as pl
from jax.experimental.pallas import tpu as pltpu

_PACK = 16  # original rows packed per lane-dense row (16 rows * 8 feats = 128 lanes)


def _packed_linear_kernel(xp_ref, w_ref, b_ref, op_ref):
    # xp : [tb, 128]     16 input rows packed per sublane row (lane-dense load)
    # w  : [128, 16*C]   block-diagonal replicated fused weight (VMEM-resident)
    # b  : [1,   16*C]   replicated fused bias (VMEM-resident)
    # op : [tb, 16*C]    16 output rows packed per sublane row (lane-dense store)
    op_ref[...] = (
        jnp.dot(xp_ref[...], w_ref[...], preferred_element_type=jnp.float32)
        + b_ref[...]
    ).astype(op_ref.dtype)


def net_forward(x, w1, b1, w2, b2, *, tile_b=32768, min_pallas_batch=4096):
    """fc2(fc1(x)) with PyTorch-style params.

    x: [B, 8]; w1: [4, 8]; b1: [1, 4]; w2: [C, 4]; b2: [1, C]. Returns [B, C].
    """
    B = x.shape[0]
    C = w2.shape[0]
    x = x.astype(jnp.float32)

    # Algebraic fusion (valid: no activation between the two linears):
    #   y = (x @ w1.T + b1) @ w2.T + b2 = x @ (w2 @ w1).T + (b1 @ w2.T + b2)
    w_eff = (w2 @ w1).astype(jnp.float32)          # [C, 8]
    b_eff = (b1 @ w2.T + b2).astype(jnp.float32)   # [1, C]

    if B < min_pallas_batch:
        # Launch + packing overhead dominates at small B: plain XLA GEMV.
        return x @ w_eff.T + b_eff

    P = _PACK
    B_pad = ((B + P - 1) // P) * P
    if B_pad != B:
        x = jnp.pad(x, ((0, B_pad - B), (0, 0)))
    packed_rows = B_pad // P

    # Free (contiguous) reshape -- NOT a transpose: [B_pad, 8] -> [B_pad/16, 128].
    xp = x.reshape(packed_rows, P * 8)

    # Block-diagonal replicated weight / tiled bias so the packed layout computes
    # the same per-row GEMV:
    #   op[r, j*C + c] = sum_f x[16r + j, f] * w_eff[c, f] + b_eff[c]
    w_big = jnp.kron(jnp.eye(P, dtype=jnp.float32), w_eff.T)   # [128, 16*C] (~80 KB)
    b_big = jnp.tile(b_eff, (1, P))                             # [1,   16*C]

    n_out = P * C
    tile_rows = max(tile_b // P, 8)
    if packed_rows <= tile_rows:
        tb = packed_rows               # single full-extent block (sidesteps (8,128) rule)
    else:
        tb = tile_rows
        assert tb % 8 == 0, "packed batch tile must be a multiple of 8 rows"
    grid = (pl.cdiv(packed_rows, tb),)

    cost = pl.CostEstimate(
        flops=2 * packed_rows * (P * 8) * n_out,
        transcendentals=0,
        bytes_accessed=4 * (packed_rows * (P * 8)      # x read
                            + packed_rows * n_out      # y write
                            + (P * 8) * n_out + n_out  # weights/bias
                            ),
    )

    op = pl.pallas_call(
        _packed_linear_kernel,
        out_shape=jax.ShapeDtypeStruct((packed_rows, n_out), jnp.float32),
        grid=grid,
        in_specs=[
            pl.BlockSpec((tb, P * 8), lambda i: (i, 0)),      # packed x: streamed
            pl.BlockSpec((P * 8, n_out), lambda i: (0, 0)),   # W_big: VMEM-resident
            pl.BlockSpec((1, n_out), lambda i: (0, 0)),       # b_big: VMEM-resident
        ],
        out_specs=pl.BlockSpec((tb, n_out), lambda i: (i, 0)),
        compiler_params=pltpu.CompilerParams(
            dimension_semantics=("parallel",)),
        cost_estimate=cost,
    )(xp, w_big, b_big)

    # Free reshape back: [B_pad/16, 16*C] -> [B_pad, C]; drop padded rows.
    y = op.reshape(B_pad, C)
    return y[:B] if B_pad != B else y


def init_params(key, num_class=10):
    # Deterministic init mirroring nn.Linear's default U(-1/sqrt(fan_in), ...).
    k1, k2, k3, k4 = jax.random.split(key, 4)
    bound1 = 1.0 / jnp.sqrt(8.0)
    bound2 = 1.0 / jnp.sqrt(4.0)
    w1 = jax.random.uniform(k1, (4, 8), jnp.float32, -bound1, bound1)
    b1 = jax.random.uniform(k2, (1, 4), jnp.float32, -bound1, bound1)
    w2 = jax.random.uniform(k3, (num_class, 4), jnp.float32, -bound2, bound2)
    b2 = jax.random.uniform(k4, (1, num_class), jnp.float32, -bound2, bound2)
    return w1, b1, w2, b2


def _reference(x, w1, b1, w2, b2):
    # Unfused pure-JAX reference matching the PyTorch forward exactly.
    return (x @ w1.T + b1) @ w2.T + b2


if __name__ == "__main__":
    key = jax.random.PRNGKey(0)
    kx1, kx2, kp = jax.random.split(key, 3)

    num_class = 10
    w1, b1, w2, b2 = init_params(kp, num_class)

    # Case 1: tiny batch, forced through the Pallas path (single packed block).
    B1 = 8
    x1 = jax.random.normal(kx1, (B1, 8), jnp.float32)
    out1 = jax.block_until_ready(
        net_forward(x1, w1, b1, w2, b2, min_pallas_batch=0))
    ref1 = _reference(x1, w1, b1, w2, b2)
    assert out1.shape == (B1, num_class)
    assert jnp.allclose(out1, ref1, atol=1e-5, rtol=1e-5)

    # Case 2: batch not a multiple of 16 nor of the tile -> exercises zero-pad
    # packing and a multi-step grid (tile_b=512 rows -> 32 packed rows/block).
    B2 = 700
    x2 = jax.random.normal(kx2, (B2, 8), jnp.float32)
    out2 = jax.block_until_ready(
        net_forward(x2, w1, b1, w2, b2, tile_b=512, min_pallas_batch=0))
    ref2 = _reference(x2, w1, b1, w2, b2)
    assert out2.shape == (B2, num_class)
    assert jnp.allclose(out2, ref2, atol=1e-5, rtol=1e-5)

    # Case 3: small-batch auto-dispatch (plain-XLA fast path), sanity check.
    out3 = jax.block_until_ready(net_forward(x1, w1, b1, w2, b2))
    assert jnp.allclose(out3, ref1, atol=1e-5, rtol=1e-5)

    print("KERNEL_OK")
</pallas_src>

<mosaic_0001>
module attributes {stable_mosaic.version = 11 : i64} {
  func.func @_packed_linear_kernel(%arg0: i32, %arg1: memref<1x128xf32, #tpu.memory_space<vmem>>, %arg2: memref<128x160xf32, #tpu.memory_space<vmem>>, %arg3: memref<1x160xf32, #tpu.memory_space<vmem>>, %arg4: memref<1x160xf32, #tpu.memory_space<vmem>>) attributes {dimension_semantics = [#tpu.dimension_semantics<parallel>], iteration_bounds = array<i64: 1>, scalar_prefetch = 0 : i64, scratch_operands = 0 : i64, tpu.core_type = #tpu.core_type<tc>, window_params = [{transform_indices = @transform_0, window_bounds = array<i64: 1, 128>}, {pipeline_mode = #tpu.pipeline_mode<synchronous>, transform_indices = @transform_1, window_bounds = array<i64: 128, 160>}, {pipeline_mode = #tpu.pipeline_mode<synchronous>, transform_indices = @transform_2, window_bounds = array<i64: 1, 160>}, {transform_indices = @transform_3, window_bounds = array<i64: 1, 160>}]} {
    %c0 = arith.constant 0 : index
    %c0_0 = arith.constant 0 : index
    %0 = vector.load %arg1[%c0, %c0_0] : memref<1x128xf32, #tpu.memory_space<vmem>>, vector<1x128xf32>
    %c0_1 = arith.constant 0 : index
    %c0_2 = arith.constant 0 : index
    %1 = vector.load %arg2[%c0_1, %c0_2] : memref<128x160xf32, #tpu.memory_space<vmem>>, vector<128x160xf32>
    %cst = arith.constant dense<0.000000e+00> : vector<1x160xf32>
    %2 = tpu.matmul %0, %1, %cst {dimension_numbers = #tpu.dot_dimension_numbers<[1], [0], [0], [1], [0, 0, 1, 1], [], []>} : vector<1x128xf32>, vector<128x160xf32>, vector<1x160xf32> -> vector<1x160xf32>
    %c0_3 = arith.constant 0 : index
    %c0_4 = arith.constant 0 : index
    %3 = vector.load %arg3[%c0_3, %c0_4] : memref<1x160xf32, #tpu.memory_space<vmem>>, vector<1x160xf32>
    %4 = arith.addf %2, %3 : vector<1x160xf32>
    %c0_5 = arith.constant 0 : index
    %c0_6 = arith.constant 0 : index
    %5 = vector.load %arg4[%c0_5, %c0_6] : memref<1x160xf32, #tpu.memory_space<vmem>>, vector<1x160xf32>
    tpu.vector_store %arg4[%c0_5, %c0_6], %4 {strides = array<i32>} : memref<1x160xf32, #tpu.memory_space<vmem>>, vector<1x160xf32>,
    return
  }
  func.func @transform_0(%arg0: i32) -> (i32, i32) {
    %c0_i32 = arith.constant 0 : i32
    %c0_i32_0 = arith.constant 0 : i32
    return %arg0, %c0_i32 : i32, i32
  }
  func.func @transform_1(%arg0: i32) -> (i32, i32) {
    %c0_i32 = arith.constant 0 : i32
    %c0_i32_0 = arith.constant 0 : i32
    %c0_i32_1 = arith.constant 0 : i32
    return %c0_i32, %c0_i32_0 : i32, i32
  }
  func.func @transform_2(%arg0: i32) -> (i32, i32) {
    %c0_i32 = arith.constant 0 : i32
    %c0_i32_0 = arith.constant 0 : i32
    %c0_i32_1 = arith.constant 0 : i32
    return %c0_i32, %c0_i32_0 : i32, i32
  }
  func.func @transform_3(%arg0: i32) -> (i32, i32) {
    %c0_i32 = arith.constant 0 : i32
    %c0_i32_0 = arith.constant 0 : i32
    return %arg0, %c0_i32 : i32, i32
  }
}

</mosaic_0001>

<bundles_post_ra>
// kernel: tpu_custom_call.1
= control target key start
LH: loop header
LB: loop body
LE: loop exit
PB: predicated region body
PF: predicated region fallthrough
CT: control target
= control target key end

     0   :  { %s274_s0 = inlined_call_operand.vmem [shape: f32[1,128], index: 0, kind: input, shape index: {}]   ;;  %s275_s1 = inlined_call_operand.vmem [shape: f32[128,160], index: 1, kind: input, shape index: {}]   ;;  %s276_s2 = inlined_call_operand.vmem [shape: f32[1,160], index: 2, kind: input, shape index: {}]   ;;  %s277_s3 = inlined_call_operand.hbm [shape: f32[1,160], index: 3, kind: output, shape index: {}]  }
   0x1   :  { %v47_v0 = vld [vmem:[%s275_s1 + $0xf8] sm:$0xff]  ;;  %v46_v1 = vld [vmem:[%s275_s1 + $0xf0] sm:$0xff]  ;;  %v45_v2 = vld [vmem:[%s275_s1 + $0xe8] sm:$0xff] }
   0x2   :  { %74 = vmatpush.msra.mxu1 %v47_v0  ;;  %54 = vmatpush.msra.mxu0 %v46_v1  ;;  %v44_v3 = vld [vmem:[%s275_s1 + $0xe0] sm:$0xff]  ;;  %v43_v4 = vld [vmem:[%s275_s1 + $0xd8] sm:$0xff]  ;;  %v42_v5 = vld [vmem:[%s275_s1 + $0xd0] sm:$0xff] }
   0x3   :  { %v41_v6 = vld [vmem:[%s275_s1 + $0xc8] sm:$0xff]  ;;  %v40_v7 = vld [vmem:[%s275_s1 + $0xc0] sm:$0xff]  ;;  %v39_v8 = vld [vmem:[%s275_s1 + $0xb8] sm:$0xff] }
   0x4   :  { %75 = vmatpush.msra.mxu1 %v45_v2  ;;  %55 = vmatpush.msra.mxu0 %v44_v3  ;;  %v38_v9 = vld [vmem:[%s275_s1 + $0xb0] sm:$0xff]  ;;  %v37_v10 = vld [vmem:[%s275_s1 + $0xa8] sm:$0xff]  ;;  %v36_v11 = vld [vmem:[%s275_s1 + $0xa0] sm:$0xff] }
   0x5   :  { %v35_v12 = vld [vmem:[%s275_s1 + $0x98] sm:$0xff]  ;;  %v34_v13 = vld [vmem:[%s275_s1 + $0x90] sm:$0xff] }
   0x6   :  { %76 = vmatpush.msra.mxu1 %v43_v4  ;;  %56 = vmatpush.msra.mxu0 %v42_v5 }
   0x8   :  { %77 = vmatpush.msra.mxu1 %v41_v6  ;;  %57 = vmatpush.msra.mxu0 %v40_v7 }
   0xa   :  { %78 = vmatpush.msra.mxu1 %v39_v8  ;;  %58 = vmatpush.msra.mxu0 %v38_v9 }
   0xc   :  { %79 = vmatpush.msra.mxu1 %v37_v10  ;;  %59 = vmatpush.msra.mxu0 %v36_v11 }
   0xd   :  { %8 = vsyncpa [#allocation3], 0  ;;  %v33_v14 = vld [vmem:[%s275_s1 + $0x88] sm:$0xff]  ;;  %v32_v15 = vld [vmem:[%s275_s1 + $0x80] sm:$0xff]  ;;  %v100_v36 = vlaneseq  ;;  %vm97_vm0 = vcmask 1040384  }
   0xe   :  { %80 = vmatpush.msra.mxu1 %v35_v12  ;;  %60 = vmatpush.msra.mxu0 %v34_v13  ;;  %v31_v16 = vld [vmem:[%s275_s1 + $0x78] sm:$0xff]  ;;  %v30_v17 = vld [vmem:[%s275_s1 + $0x70] sm:$0xff]  ;;  %v29_v18 = vld [vmem:[%s275_s1 + $0x68] sm:$0xff] }
   0xf   :  { %v28_v19 = vld [vmem:[%s275_s1 + $0x60] sm:$0xff]  ;;  %v27_v20 = vld [vmem:[%s275_s1 + $0x58] sm:$0xff]  ;;  %v26_v21 = vld [vmem:[%s275_s1 + $0x50] sm:$0xff]  ;;  %vm102_vm1 = vcmp.lt.s32.totalorder %v100_v36, 160 }
  0x10   :  { %81 = vmatpush.msra.mxu1 %v33_v14  ;;  %61 = vmatpush.msra.mxu0 %v32_v15  ;;  %v25_v22 = vld [vmem:[%s275_s1 + $0x48] sm:$0xff]  ;;  %v24_v23 = vld [vmem:[%s275_s1 + $0x40] sm:$0xff]  ;;  %v23_v24 = vld [vmem:[%s275_s1 + $0x38] sm:$0xff] }
  0x11   :  { %v22_v25 = vld [vmem:[%s275_s1 + $0x30] sm:$0xff]  ;;  %v21_v26 = vld [vmem:[%s275_s1 + $0x28] sm:$0xff]  ;;  %v20_v27 = vld [vmem:[%s275_s1 + $0x20] sm:$0xff] }
  0x12   :  { %82 = vmatpush.msra.mxu1 %v31_v16  ;;  %62 = vmatpush.msra.mxu0 %v30_v17  ;;  %v19_v28 = vld [vmem:[%s275_s1 + $0x18] sm:$0xff]  ;;  %v18_v29 = vld [vmem:[%s275_s1 + $0x10] sm:$0xff]  ;;  %v17_v30 = vld [vmem:[%s275_s1 + $0x8] sm:$0xff] }
  0x13   :  { %v16_v31 = vld [vmem:[%s275_s1] sm:$0xff]  ;;  %s148_s1 = smov [#allocation2]  }
  0x14   :  { %83 = vmatpush.msra.mxu1 %v29_v18  ;;  %63 = vmatpush.msra.mxu0 %v28_v19  ;;  %v15_v32 = vld [vmem:[%s274_s0] sm:$0x1]  ;;  %s110_s26 = sshll.u32 %s148_s1, 4  ;;  %s112_s0 = sshll.u32 %s277_s3, 4  ;;  %s111_s26 = int_to_ptr.vmem [resolvable:$true] %s110_s26  ;;  %s113_s0 = int_to_ptr.hbm [resolvable:$true] %s112_s0 }
  0x15   :  { %v48_v33 = vld [vmem:[%s276_s2] sm:$0x3] }
  0x16   :  { %84 = vmatpush.msra.mxu1 %v27_v20  ;;  %64 = vmatpush.msra.mxu0 %v26_v21  ;;  %v51_v34 = vperm.slane %v48_v33, 1  ;;  %v50_v35 = vperm.slane %v48_v33, 0 }
  0x18   :  { %85 = vmatpush.msra.mxu1 %v25_v22  ;;  %65 = vmatpush.msra.mxu0 %v24_v23 }
  0x1a   :  { %86 = vmatpush.msra.mxu1 %v23_v24  ;;  %66 = vmatpush.msra.mxu0 %v22_v25 }
  0x1c   :  { %87 = vmatpush.msra.mxu1 %v21_v26  ;;  %67 = vmatpush.msra.mxu0 %v20_v27 }
  0x1e   :  { %88 = vmatpush.msra.mxu1 %v19_v28  ;;  %68 = vmatpush.msra.mxu0 %v18_v29 }
  0x20   :  { %89 = vmatpush.msra.mxu1 %v17_v30  ;;  %69 = vmatpush.msra.mxu0 %v16_v31 }
  0x21   :  { %90 = vmatmul.f32.vlgmr.msra.gmra.mxu1 %v15_v32  ;;  %70 = vmatmul.f32.vlgmr.msra.gmra.mxu0 %v15_v32 }
  0x9e   :  { %v91_v37 = vpop.f32.mrf.mxu1  ;;  %v71_v38 = vpop.f32.mrf.mxu0 }
  0x9f   :  { %v92_v39 = vadd.f32 %v91_v37, %v51_v34  ;;  %v72_v40 = vadd.f32 %v71_v38, %v50_v35 }
  0xa1   :  { %v96_v41 = vrot.slane %v92_v39, 7 }
  0xa3   :  { %v98_v42 = vsel %vm97_vm0, %v72_v40, %v96_v41 }
  0xa4   :  { %104 = vst.msk [vmem:[#allocation2] sm:$0x3] %vm102_vm1, %v98_v42 }
  0xa5   :  { %115 = dma.vmem_to_hbm [thread:$0]  %s111_s26, 32, %s113_s0, [#allocation3]  }
  0xa6   :  { %146 = dma.done.wait [#allocation3], 32  }
  0xa7   :  { %147 = vsyncadd [#allocation3], 4294967264 }
  0xa8   :  { %120 = vsyncpa [#allocation3], 1 }

</bundles_post_ra>
